<compile_context>
chip_gen: v7x
topology: tpu7x:2x2x1
jax: 0.10.0
libtpu: 0.0.40
codegen_flags: <defaults>
</compile_context>

<pallas_src>
import functools
from typing import NamedTuple

import jax
import jax.numpy as jnp
from jax.experimental import pallas as pl
from jax.experimental.pallas import tpu as pltpu


def _round_up(x, m):
    return ((x + m - 1) // m) * m


class _Layout(NamedTuple):
    """Static row/lane layout of the packed bf16 parameter slab (Python ints)."""
    state_size: int
    action_size: int
    h1c: int
    h1a: int
    h2c: int
    h2a: int
    lanes: int      # slab lane width  (>= padded h1c+h1a and >= mid+out_lanes)
    mid: int        # padded (h2c + h2a)  -> hidden-2 width / W3 row count
    out_lanes: int  # padded (1 + action_size) -> output lane width
    r_b1: int       # row of the layer-1 bias
    r_w2: int       # first row of the W2 row block (W3 shares it, lanes mid:)
    r_b2: int       # row of the layer-2 bias (b3 shares it, lanes mid:)
    rows: int       # total slab rows


def make_layout(params) -> _Layout:
    s = params["critic_w1"].shape[0]
    a = params["actor_w3"].shape[1]
    h1c = params["critic_w1"].shape[1]
    h1a = params["actor_w1"].shape[1]
    h2c = params["critic_w2"].shape[1]
    h2a = params["actor_w2"].shape[1]

    mid = _round_up(h2c + h2a, 128)
    out_lanes = _round_up(1 + a, 128)
    # Wide enough for the fused [critic|actor] W1 AND for W3 packed to the
    # right of W2's live lanes.
    lanes = max(_round_up(h1c + h1a, 128), mid + out_lanes)

    # All row offsets are multiples of 16 -> static slices of the bf16 slab
    # stay on (16, 128) tile boundaries.
    r_b1 = _round_up(s, 16)
    r_w2 = r_b1 + 16
    r_b2 = r_w2 + lanes          # lanes is a multiple of 128, hence of 16
    rows = r_b2 + 16

    assert mid <= lanes and mid + out_lanes <= lanes, "slab too narrow"
    return _Layout(s, a, h1c, h1a, h2c, h2a, lanes, mid, out_lanes,
                   r_b1, r_w2, r_b2, rows)


def pack_params(params, layout: _Layout):
    """Packs all weights/biases into one [rows, lanes] bf16 slab (done once)."""
    L = layout
    slab = jnp.zeros((L.rows, L.lanes), jnp.float32)
    # Layer 1: concatenated along out_features -> lanes [0 : h1c+h1a].
    slab = slab.at[0:L.state_size, 0:L.h1c].set(params["critic_w1"])
    slab = slab.at[0:L.state_size, L.h1c:L.h1c + L.h1a].set(params["actor_w1"])
    slab = slab.at[L.r_b1, 0:L.h1c].set(params["critic_b1"].reshape(-1))
    slab = slab.at[L.r_b1, L.h1c:L.h1c + L.h1a].set(params["actor_b1"].reshape(-1))
    # Layer 2: block-diagonal in lanes [0 : mid].
    slab = slab.at[L.r_w2:L.r_w2 + L.h1c, 0:L.h2c].set(params["critic_w2"])
    slab = slab.at[L.r_w2 + L.h1c:L.r_w2 + L.h1c + L.h1a,
                   L.h2c:L.h2c + L.h2a].set(params["actor_w2"])
    slab = slab.at[L.r_b2, 0:L.h2c].set(params["critic_b2"].reshape(-1))
    slab = slab.at[L.r_b2, L.h2c:L.h2c + L.h2a].set(params["actor_b2"].reshape(-1))
    # Layer 3: block-diagonal, packed into the otherwise-dead lane half
    # [mid : mid+out_lanes] of the W2 row block / b2 row.
    # Output columns within that half: col 0 = value, cols 1:1+A = mu.
    c0 = L.mid
    slab = slab.at[L.r_w2:L.r_w2 + L.h2c, c0:c0 + 1].set(params["critic_w3"])
    slab = slab.at[L.r_w2 + L.h2c:L.r_w2 + L.h2c + L.h2a,
                   c0 + 1:c0 + 1 + L.action_size].set(params["actor_w3"])
    slab = slab.at[L.r_b2, c0:c0 + 1].set(params["critic_b3"].reshape(-1))
    slab = slab.at[L.r_b2, c0 + 1:c0 + 1 + L.action_size].set(
        params["actor_b3"].reshape(-1))
    return slab.astype(jnp.bfloat16)


def _ac_kernel(x_ref, p_ref, o_ref, *, layout: _Layout):
    """Fused actor+critic MLP: 3 block-diagonal bf16 matmuls, f32 accumulate."""
    L = layout
    x = x_ref[...].astype(jnp.bfloat16)                        # [Bt, S]

    # Layer 1 (fused critic|actor): [Bt, S] @ [S, lanes] -> [Bt, lanes]
    w1 = p_ref[0:L.state_size, :]
    b1 = p_ref[L.r_b1:L.r_b1 + 1, :].astype(jnp.float32)
    h = jnp.dot(x, w1, preferred_element_type=jnp.float32) + b1
    h = jnp.maximum(h, 0.0).astype(jnp.bfloat16)

    # Layer 2 (block-diagonal): [Bt, lanes] @ [lanes, mid] -> [Bt, mid]
    w2 = p_ref[L.r_w2:L.r_w2 + L.lanes, 0:L.mid]
    b2 = p_ref[L.r_b2:L.r_b2 + 1, 0:L.mid].astype(jnp.float32)
    h = jnp.dot(h, w2, preferred_element_type=jnp.float32) + b2
    h = jnp.maximum(h, 0.0).astype(jnp.bfloat16)

    # Layer 3 (block-diagonal, packed in lanes [mid : mid+out_lanes]):
    # [Bt, mid] @ [mid, out_lanes] -> [Bt, out_lanes]
    # (col 0 = value, cols 1:1+A = mu, rest zero pad)
    w3 = p_ref[L.r_w2:L.r_w2 + L.mid, L.mid:L.mid + L.out_lanes]
    b3 = p_ref[L.r_b2:L.r_b2 + 1, L.mid:L.mid + L.out_lanes].astype(jnp.float32)
    out = jnp.dot(h, w3, preferred_element_type=jnp.float32) + b3
    o_ref[...] = out.astype(o_ref.dtype)


@functools.partial(jax.jit, static_argnames=("layout",))
def fc_actor_critic_forward(state, slab, log_std, *, layout: _Layout):
    """Returns (mu, cov_mat, value); cov_mat = diag(exp(log_std))[None]."""
    L = layout
    b = state.shape[0]
    # Batch tiling:
    #  - small B: one block (block == full array, layout constraints trivially met)
    #  - large B: >=2 tiles of up to 2048 rows (16-aligned) so the "parallel"
    #    axis shards across both TensorCores on v7x and per-step overhead is
    #    amortized with big tiles on v5e/v6e.
    if b <= 64:
        bt = _round_up(b, 8)
    else:
        bt = min(2048, _round_up((b + 1) // 2, 16))
    b_pad = _round_up(b, bt)
    if b_pad != b:
        state = jnp.pad(state, ((0, b_pad - b), (0, 0)))

    out = pl.pallas_call(
        functools.partial(_ac_kernel, layout=L),
        out_shape=jax.ShapeDtypeStruct((b_pad, L.out_lanes), jnp.bfloat16),
        grid=(b_pad // bt,),
        in_specs=[
            # state tile: keep the true (un-padded-to-128) lane width.
            pl.BlockSpec((bt, L.state_size), lambda i: (i, 0)),
            # parameter slab: constant block index -> fetched once, resident.
            pl.BlockSpec((L.rows, L.lanes), lambda i: (0, 0)),
        ],
        out_specs=pl.BlockSpec((bt, L.out_lanes), lambda i: (i, 0)),
        compiler_params=pltpu.CompilerParams(
            dimension_semantics=("parallel",)),
    )(state, slab)

    value = out[:b, 0:1].astype(jnp.float32)
    mu = out[:b, 1:1 + L.action_size].astype(jnp.float32)

    # std / cov_mat are state-independent glue -> computed outside the kernel.
    # Matches the PyTorch module exactly: torch.diag(std) (std, not std**2).
    std = jnp.exp(log_std).reshape(-1).astype(jnp.float32)
    cov_mat = (jnp.eye(L.action_size, dtype=jnp.float32) * std[None, :])[None, :, :]
    # TODO(synk): MultivariateNormal(mu, cov_mat) distribution object is
    # host-side glue with no Pallas equivalent; we return its parameters.
    return mu, cov_mat, value


# ----------------------------------------------------------------------------
# Parameter init (PyTorch nn.Linear-style uniform) and plain-JAX f32 reference.
# ----------------------------------------------------------------------------
def _linear_init(key, fan_in, fan_out):
    kw, kb = jax.random.split(key)
    bound = 1.0 / jnp.sqrt(jnp.float32(fan_in))
    w = jax.random.uniform(kw, (fan_in, fan_out), jnp.float32, -bound, bound)
    b = jax.random.uniform(kb, (1, fan_out), jnp.float32, -bound, bound)
    return w, b


def init_params(key, state_size, action_size,
                actor_hidden_layers=(128, 16),
                critic_hidden_layers=(128, 16),
                std=0.0):
    keys = jax.random.split(key, 6)
    ch = list(critic_hidden_layers)
    ah = list(actor_hidden_layers)

    cw1, cb1 = _linear_init(keys[0], state_size, ch[0])
    cw2, cb2 = _linear_init(keys[1], ch[0], ch[1])
    cw3, cb3 = _linear_init(keys[2], ch[1], 1)

    aw1, ab1 = _linear_init(keys[3], state_size, ah[0])
    aw2, ab2 = _linear_init(keys[4], ah[0], ah[1])
    aw3, ab3 = _linear_init(keys[5], ah[1], action_size)

    return {
        "critic_w1": cw1, "critic_b1": cb1,
        "critic_w2": cw2, "critic_b2": cb2,
        "critic_w3": cw3, "critic_b3": cb3,
        "actor_w1": aw1, "actor_b1": ab1,
        "actor_w2": aw2, "actor_b2": ab2,
        "actor_w3": aw3, "actor_b3": ab3,
        "log_std": jnp.full((1, action_size), std, dtype=jnp.float32),
    }


def _reference_forward(state, params):
    def relu(x):
        return jnp.maximum(x, 0.0)
    h = relu(state @ params["critic_w1"] + params["critic_b1"])
    h = relu(h @ params["critic_w2"] + params["critic_b2"])
    value = h @ params["critic_w3"] + params["critic_b3"]
    a = relu(state @ params["actor_w1"] + params["actor_b1"])
    a = relu(a @ params["actor_w2"] + params["actor_b2"])
    mu = a @ params["actor_w3"] + params["actor_b3"]
    std = jnp.exp(params["log_std"])[0]
    cov = (jnp.eye(std.shape[0]) * std[None, :])[None, :, :]
    return mu, cov, value


if __name__ == "__main__":
    STATE_SIZE = 32
    ACTION_SIZE = 4
    BATCH = 8

    key = jax.random.PRNGKey(0)
    k_params, k_state = jax.random.split(key)

    params = init_params(k_params, STATE_SIZE, ACTION_SIZE, std=0.0)
    layout = make_layout(params)
    slab = jax.block_until_ready(pack_params(params, layout))  # packed once

    state = jax.random.normal(k_state, (BATCH, STATE_SIZE), dtype=jnp.float32)

    mu, cov_mat, value = fc_actor_critic_forward(
        state, slab, params["log_std"], layout=layout)
    jax.block_until_ready((mu, cov_mat, value))

    mu_ref, cov_ref, value_ref = _reference_forward(state, params)
    assert mu.shape == (BATCH, ACTION_SIZE)
    assert cov_mat.shape == (1, ACTION_SIZE, ACTION_SIZE)
    assert value.shape == (BATCH, 1)
    # bf16 operands / bf16 output slab with f32 accumulation -> loosened tol.
    assert jnp.allclose(mu, mu_ref, atol=5e-2, rtol=5e-2), "mu mismatch"
    assert jnp.allclose(cov_mat, cov_ref, atol=1e-5), "cov mismatch"
    assert jnp.allclose(value, value_ref, atol=5e-2, rtol=5e-2), "value mismatch"

    print("KERNEL_OK")
</pallas_src>

<mosaic_0001>
module attributes {stable_mosaic.version = 11 : i64} {
  func.func @_ac_kernel(%arg0: i32, %arg1: memref<8x32xf32, #tpu.memory_space<vmem>>, %arg2: memref<320x256xbf16, #tpu.memory_space<vmem>>, %arg3: memref<8x128xbf16, #tpu.memory_space<vmem>>) attributes {dimension_semantics = [#tpu.dimension_semantics<parallel>], iteration_bounds = array<i64: 1>, scalar_prefetch = 0 : i64, scratch_operands = 0 : i64, tpu.core_type = #tpu.core_type<tc>, window_params = [{transform_indices = @transform_0, window_bounds = array<i64: 8, 32>}, {pipeline_mode = #tpu.pipeline_mode<synchronous>, transform_indices = @transform_1, window_bounds = array<i64: 320, 256>}, {transform_indices = @transform_2, window_bounds = array<i64: 8, 128>}]} {
    %c0 = arith.constant 0 : index
    %c0_0 = arith.constant 0 : index
    %0 = vector.load %arg1[%c0, %c0_0] : memref<8x32xf32, #tpu.memory_space<vmem>>, vector<8x32xf32>
    %1 = arith.truncf %0 : vector<8x32xf32> to vector<8x32xbf16>
    %c0_1 = arith.constant 0 : index
    %c0_2 = arith.constant 0 : index
    %2 = vector.load %arg2[%c0_1, %c0_2] : memref<320x256xbf16, #tpu.memory_space<vmem>>, vector<32x256xbf16>
    %c32 = arith.constant 32 : index
    %c0_3 = arith.constant 0 : index
    %3 = vector.load %arg2[%c32, %c0_3] : memref<320x256xbf16, #tpu.memory_space<vmem>>, vector<1x256xbf16>
    %4 = arith.extf %3 : vector<1x256xbf16> to vector<1x256xf32>
    %cst = arith.constant dense<0.000000e+00> : vector<8x256xf32>
    %5 = tpu.matmul %1, %2, %cst {dimension_numbers = #tpu.dot_dimension_numbers<[1], [0], [0], [1], [0, 0, 1, 1], [], []>} : vector<8x32xbf16>, vector<32x256xbf16>, vector<8x256xf32> -> vector<8x256xf32>
    %6 = vector.broadcast %4 : vector<1x256xf32> to vector<8x256xf32>
    %7 = arith.addf %5, %6 : vector<8x256xf32>
    %cst_4 = arith.constant 0.000000e+00 : f32
    %8 = vector.broadcast %cst_4 : f32 to vector<8x256xf32>
    %9 = arith.maximumf %7, %8 : vector<8x256xf32>
    %10 = arith.truncf %9 : vector<8x256xf32> to vector<8x256xbf16>
    %c48 = arith.constant 48 : index
    %c0_5 = arith.constant 0 : index
    %11 = vector.load %arg2[%c48, %c0_5] : memref<320x256xbf16, #tpu.memory_space<vmem>>, vector<256x128xbf16>
    %c304 = arith.constant 304 : index
    %c0_6 = arith.constant 0 : index
    %12 = vector.load %arg2[%c304, %c0_6] : memref<320x256xbf16, #tpu.memory_space<vmem>>, vector<1x128xbf16>
    %13 = arith.extf %12 : vector<1x128xbf16> to vector<1x128xf32>
    %cst_7 = arith.constant dense<0.000000e+00> : vector<8x128xf32>
    %14 = tpu.matmul %10, %11, %cst_7 {dimension_numbers = #tpu.dot_dimension_numbers<[1], [0], [0], [1], [0, 0, 1, 1], [], []>} : vector<8x256xbf16>, vector<256x128xbf16>, vector<8x128xf32> -> vector<8x128xf32>
    %15 = vector.broadcast %13 : vector<1x128xf32> to vector<8x128xf32>
    %16 = arith.addf %14, %15 : vector<8x128xf32>
    %cst_8 = arith.constant 0.000000e+00 : f32
    %17 = vector.broadcast %cst_8 : f32 to vector<8x128xf32>
    %18 = arith.maximumf %16, %17 : vector<8x128xf32>
    %19 = arith.truncf %18 : vector<8x128xf32> to vector<8x128xbf16>
    %c48_9 = arith.constant 48 : index
    %c128 = arith.constant 128 : index
    %20 = vector.load %arg2[%c48_9, %c128] : memref<320x256xbf16, #tpu.memory_space<vmem>>, vector<128x128xbf16>
    %c304_10 = arith.constant 304 : index
    %c128_11 = arith.constant 128 : index
    %21 = vector.load %arg2[%c304_10, %c128_11] : memref<320x256xbf16, #tpu.memory_space<vmem>>, vector<1x128xbf16>
    %22 = arith.extf %21 : vector<1x128xbf16> to vector<1x128xf32>
    %cst_12 = arith.constant dense<0.000000e+00> : vector<8x128xf32>
    %23 = tpu.matmul %19, %20, %cst_12 {dimension_numbers = #tpu.dot_dimension_numbers<[1], [0], [0], [1], [0, 0, 1, 1], [], []>} : vector<8x128xbf16>, vector<128x128xbf16>, vector<8x128xf32> -> vector<8x128xf32>
    %24 = vector.broadcast %22 : vector<1x128xf32> to vector<8x128xf32>
    %25 = arith.addf %23, %24 : vector<8x128xf32>
    %26 = arith.truncf %25 : vector<8x128xf32> to vector<8x128xbf16>
    %c0_13 = arith.constant 0 : index
    %c0_14 = arith.constant 0 : index
    %27 = vector.load %arg3[%c0_13, %c0_14] : memref<8x128xbf16, #tpu.memory_space<vmem>>, vector<8x128xbf16>
    tpu.vector_store %arg3[%c0_13, %c0_14], %26 {strides = array<i32>} : memref<8x128xbf16, #tpu.memory_space<vmem>>, vector<8x128xbf16>,
    return
  }
  func.func @transform_0(%arg0: i32) -> (i32, i32) {
    %c0_i32 = arith.constant 0 : i32
    %c0_i32_0 = arith.constant 0 : i32
    return %arg0, %c0_i32 : i32, i32
  }
  func.func @transform_1(%arg0: i32) -> (i32, i32) {
    %c0_i32 = arith.constant 0 : i32
    %c0_i32_0 = arith.constant 0 : i32
    %c0_i32_1 = arith.constant 0 : i32
    return %c0_i32, %c0_i32_0 : i32, i32
  }
  func.func @transform_2(%arg0: i32) -> (i32, i32) {
    %c0_i32 = arith.constant 0 : i32
    %c0_i32_0 = arith.constant 0 : i32
    return %arg0, %c0_i32 : i32, i32
  }
}

</mosaic_0001>

<bundles_post_ra>
// kernel: fc_actor_critic_forward.1
= control target key start
LH: loop header
LB: loop body
LE: loop exit
PB: predicated region body
PF: predicated region fallthrough
CT: control target
= control target key end

     0   :  { %7 = vsyncpa [#allocation3], 0  ;;  %s639_s0 = inlined_call_operand.hbm [shape: f32[8,32], index: 0, kind: input, shape index: {}]   ;;  %s640_s1 = inlined_call_operand.hbm [shape: bf16[320,256], index: 1, kind: input, shape index: {}]   ;;  %s641_s2 = inlined_call_operand.vmem [shape: bf16[8,128], index: 2, kind: output, shape index: {}]  }
   0x1   :  { %8 = vsyncpa [#allocation5], 0  ;;  %s583_s9 = smov [#allocation2]   ;;  %s584_s11 = smov [#allocation4]  }
   0x2   :  { %s15_s10 = sshll.u32 %s583_s9, 4  ;;  %s24_s12 = sshll.u32 %s584_s11, 4  ;;  %s16_s10 = int_to_ptr.vmem [resolvable:$true] %s15_s10  ;;  %s605_s12 = int_to_ptr.vmem [resolvable:$true] %s24_s12 }
   0x3   :  { %s535_s15 = scalar_lea.hbm %s639_s0, 128 }
   0x4   :  { %p536_p0 = scmp.ne.s32.totalorder %s639_s0, %s535_s15  ;;  %p539_p1 = scmp.lt.u32.totalorder %s535_s15, %s639_s0 }
   0x6   :  { %p541_p2 = pnand %p539_p1, %p536_p0 }
   0x8   :  { %544 = shalt.err (!%p541_p2)
}
   0x9   :  { %s545_s20 = scalar_lea.vmem %s16_s10, 128  ;;  %p550_p4 = scmp.lt.s32.totalorder %s16_s10, %s16_s10 }
   0xa   :  { %p546_p3 = scmp.ne.s32.totalorder %s16_s10, %s545_s20  ;;  %p551_p5 = scmp.lt.s32.totalorder %s545_s20, %s545_s20 }
   0xc   :  { %p552_p6 = por %p551_p5, %p550_p4 }
   0xe   :  { %p553_p7 = pnand %p552_p6, %p546_p3 }
  0x10   :  { %556 = shalt.err (!%p553_p7)
}
  0x11   :  { %18 = dma.hbm_to_vmem [thread:$0]  %s639_s0, 128, %s16_s10, [#allocation3]  }
  0x12   :  { %s557_s25 = scalar_lea.hbm %s640_s1, 5120 }
  0x13   :  { %p558_p8 = scmp.ne.s32.totalorder %s640_s1, %s557_s25  ;;  %p561_p9 = scmp.lt.u32.totalorder %s557_s25, %s640_s1 }
  0x15   :  { %p563_p10 = pnand %p561_p9, %p558_p8 }
  0x17   :  { %566 = shalt.err (!%p563_p10)
}
  0x18   :  { %s567_s30 = scalar_lea.vmem %s605_s12, 5120  ;;  %p572_p12 = scmp.lt.s32.totalorder %s605_s12, %s605_s12 }
  0x19   :  { %p568_p11 = scmp.ne.s32.totalorder %s605_s12, %s567_s30  ;;  %p573_p13 = scmp.lt.s32.totalorder %s567_s30, %s567_s30 }
  0x1b   :  { %p574_p0 = por %p573_p13, %p572_p12 }
  0x1d   :  { %p575_p1 = pnand %p574_p0, %p568_p11 }
  0x1f   :  { %578 = shalt.err (!%p575_p1)
}
  0x20   :  { %s585_s0 = smov 128   ;;  %s586_s3 = smov 8  }
  0x21   :  { %30 = dma.hbm_to_vmem [thread:$0]  %s640_s1, 5120, %s605_s12, [#allocation5], %s585_s0, %s585_s0, %s586_s3  }
  0x22   :  { %579 = dma.done.wait [#allocation3], 128  }
  0x23   :  { %580 = vsyncadd [#allocation3], 4294967168 }
  0x24   :  { %581 = dma.done.wait [#allocation5], 5120  }
  0x25   :  { %582 = vsyncadd [#allocation5], 4294962176  ;;  %v587_v0 = vmov 0   ;;  %v505_v1 = vld [vmem:[#allocation4 + $0x4] ss:$8 sps:$4 sm:$0xff]   ;;  %v38_v5 = vld [vmem:[#allocation2] sm:$0xff]  ;;  %v47_v30 = vlaneseq }
  0x26   :  { %111 = vmatprep.mubr.bf16.mxu0 %v587_v0  ;;  %v507_v2 = vld [vmem:[#allocation4] ss:$8 sps:$4 sm:$0xff]   ;;  %79 = vmatprep.subr.bf16.mxu0 %v505_v1  ;;  %v508_v3 = vld [vmem:[#allocation4 + $0x14] ss:$8 sps:$4 sm:$0xff]   ;;  %v510_v4 = vld [vmem:[#allocation4 + $0x10] ss:$8 sps:$4 sm:$0xff]   ;;  %v39_v9 = vpack.c.bf16 %v38_v5, %v38_v5 }
  0x27   :  { %vm75_vm0 = vcmask 261120   ;;  %80 = vmatpush1.bf16.msra.mxu0 %v507_v2  ;;  %v511_v6 = vld [vmem:[#allocation4 + $0xb0] ss:$8 sps:$4 sm:$0xff]   ;;  %v513_v8 = vld [vmem:[#allocation4 + $0xc0] ss:$8 sps:$4 sm:$0xff]   ;;  %v588_v24 = vmov 0.0  }
  0x28   :  { %81 = vmatprep.subr.bf16.mxu0 %v508_v3  ;;  %v512_v7 = vld [vmem:[#allocation4 + $0x30] ss:$8 sps:$4 sm:$0xff]   ;;  %447 = vmatprep.subr.bf16.mxu1 %v511_v6  ;;  %v514_v10 = vld [vmem:[#allocation4 + $0x40] ss:$8 sps:$4 sm:$0xff]   ;;  %v527_v23 = vld [vmem:[#allocation4 + $0x34] ss:$8 sps:$4 sm:$0xff]  }
  0x29   :  { %448 = vmatpush3.bf16.msra.mxu1 %v512_v7  ;;  %v515_v11 = vld [vmem:[#allocation4 + $0xd0] ss:$8 sps:$4 sm:$0xff]   ;;  %v517_v13 = vld [vmem:[#allocation4 + $0xe0] ss:$8 sps:$4 sm:$0xff]   ;;  %v528_v25 = vld [vmem:[#allocation4 + $0x44] ss:$8 sps:$4 sm:$0xff]  }
  0x2a   :  { %449 = vmatprep.subr.bf16.mxu1 %v513_v8  ;;  %v516_v12 = vld [vmem:[#allocation4 + $0x50] ss:$8 sps:$4 sm:$0xff]   ;;  %v518_v14 = vld [vmem:[#allocation4 + $0x60] ss:$8 sps:$4 sm:$0xff]   ;;  %v529_v26 = vld [vmem:[#allocation4 + $0x54] ss:$8 sps:$4 sm:$0xff]  }
  0x2b   :  { %82 = vmatpush1.bf16.msra.mxu0 %v510_v4  ;;  %v519_v15 = vld [vmem:[#allocation4 + $0xf0] ss:$8 sps:$4 sm:$0xff]   ;;  %v521_v17 = vld [vmem:[#allocation4 + $0x100] ss:$8 sps:$4 sm:$0xff]   ;;  %v530_v27 = vld [vmem:[#allocation4 + $0x64] ss:$8 sps:$4 sm:$0xff]  }
  0x2c   :  { %v520_v16 = vld [vmem:[#allocation4 + $0x70] ss:$8 sps:$4 sm:$0xff]   ;;  %v522_v18 = vld [vmem:[#allocation4 + $0x80] ss:$8 sps:$4 sm:$0xff]   ;;  %478 = vmatprep.subr.bf16.mxu0 %v588_v24  ;;  %v531_v28 = vld [vmem:[#allocation4 + $0x74] ss:$8 sps:$4 sm:$0xff]  }
  0x2d   :  { %450 = vmatpush3.bf16.msra.mxu1 %v514_v10  ;;  %v523_v19 = vld [vmem:[#allocation4 + $0x110] ss:$8 sps:$4 sm:$0xff]   ;;  %v525_v21 = vld [vmem:[#allocation4 + $0x120] ss:$8 sps:$4 sm:$0xff]   ;;  %v532_v29 = vld [vmem:[#allocation4 + $0x84] ss:$8 sps:$4 sm:$0xff]  }
  0x2e   :  { %422 = vmatmul.mubr.msk.bf16.vlgmr.msra.gmra.mrb[0].mxu0 %vm75_vm0, %v39_v9  ;;  %451 = vmatprep.subr.bf16.mxu1 %v515_v11  ;;  %v524_v20 = vld [vmem:[#allocation4 + $0x90] ss:$8 sps:$4 sm:$0xff]   ;;  %v526_v22 = vld [vmem:[#allocation4 + $0xa0] ss:$8 sps:$4 sm:$0xff]   ;;  %v48_v31 = vshrl.u32 %v47_v30, 7  ;;  %vm589_vm1 = vmmov 0  }
  0x2f   :  { %479 = vmatpush3.bf16.msra.mxu0 %v527_v23  ;;  %v44_v32 = vld [vmem:[#allocation4 + $0x20] sm:$0x11]  ;;  %v533_v48 = vld [vmem:[#allocation4 + $0x94] ss:$8 sps:$4 sm:$0xff]   ;;  %494 = vmatprep.mubr.msk.bf16.mxu0 %vm589_vm1, %v588_v24  ;;  %v156_v50 = vld [vmem:[#allocation4 + $0x130] sm:$0x1] }
  0x30   :  { %480 = vmatprep.subr.bf16.mxu0 %v588_v24  ;;  %v45_v33 = vunpack.c.l.bf16 %v44_v32  ;;  %v49_v34 = vsub.s32 0, %v48_v31  ;;  %v46_v35 = vunpack.c.h.bf16 %v44_v32  ;;  %v534_v49 = vld [vmem:[#allocation4 + $0xa4] ss:$8 sps:$4 sm:$0xff]   ;;  %v157_v51 = vunpack.c.l.bf16 %v156_v50  ;;  %v316_v61 = vld [vmem:[#allocation4 + $0x134] sm:$0x1] }
  0x31   :  { %452 = vmatpush3.bf16.msra.mxu1 %v516_v12  ;;  %v317_v62 = vunpack.c.l.bf16 %v316_v61 }
  0x32   :  { %453 = vmatprep.subr.bf16.mxu1 %v517_v13  ;;  %v50_v36 = vrot.slane %v45_v33, %v49_v34  ;;  %v54_v37 = vrot.slane %v46_v35, %v49_v34  ;;  %v161_v53 = vrot.slane %v157_v51, %v49_v34 }
  0x33   :  { %481 = vmatpush3.bf16.msra.mxu0 %v528_v25  ;;  %v321_v63 = vrot.slane %v317_v62, %v49_v34 }
  0x34   :  { %482 = vmatprep.subr.bf16.mxu0 %v588_v24 }
  0x35   :  { %454 = vmatpush3.bf16.msra.mxu1 %v518_v14 }
  0x36   :  { %455 = vmatprep.subr.bf16.mxu1 %v519_v15 }
  0x37   :  { %483 = vmatpush3.bf16.msra.mxu0 %v529_v26 }
  0x38   :  { %484 = vmatprep.subr.bf16.mxu0 %v588_v24 }
  0x39   :  { %456 = vmatpush3.bf16.msra.mxu1 %v520_v16 }
  0x3a   :  { %457 = vmatprep.subr.bf16.mxu1 %v521_v17 }
  0x3b   :  { %485 = vmatpush3.bf16.msra.mxu0 %v530_v27 }
  0x3c   :  { %486 = vmatprep.subr.bf16.mxu0 %v588_v24 }
  0x3d   :  { %458 = vmatpush3.bf16.msra.mxu1 %v522_v18 }
  0x3e   :  { %459 = vmatprep.subr.bf16.mxu1 %v523_v19 }
  0x3f   :  { %487 = vmatpush3.bf16.msra.mxu0 %v531_v28 }
  0x40   :  { %488 = vmatprep.subr.bf16.mxu0 %v588_v24 }
  0x41   :  { %460 = vmatpush3.bf16.msra.mxu1 %v524_v20 }
  0x42   :  { %461 = vmatprep.subr.bf16.mxu1 %v525_v21 }
  0x43   :  { %489 = vmatpush3.bf16.msra.mxu0 %v532_v29 }
  0x44   :  { %490 = vmatprep.subr.bf16.mxu0 %v588_v24 }
  0x45   :  { %462 = vmatpush3.bf16.msra.mxu1 %v526_v22 }
  0x47   :  { %491 = vmatpush3.bf16.msra.mxu0 %v533_v48 }
  0x48   :  { %492 = vmatprep.subr.bf16.mxu0 %v588_v24 }
  0x4b   :  { %493 = vmatpush3.bf16.msra.mxu0 %v534_v49 }
 0x101   :  { %v113_v38 = vpop.f32.mrb[0].mxu0 }
 0x102   :  { %v114_v39 = vadd.f32 %v113_v38, %v50_v36  ;;  %v115_v40 = vpop.f32.mrb[1].mxu0 }
 0x103   :  { %v116_v41 = vadd.f32 %v115_v40, %v54_v37  ;;  %v117_v42 = vpop.f32.mrb[2].mxu0 }
 0x104   :  { %v120_v43 = vmax.f32 %v114_v39, 0.0  ;;  %v118_v44 = vpop.f32.mrb[3].mxu0 }
 0x105   :  { %v121_v45 = vmax.f32 %v116_v41, 0.0 }
 0x106   :  { %v122_v47 = vpack.c.bf16 %v120_v43, %v120_v43 }
 0x107   :  { %v123_v46 = vpack.c.bf16 %v121_v45, %v121_v45 }
 0x109   :  { %290 = vmatprep.mubr.bf16.mxu1 %v123_v46 }
 0x10a   :  { %291 = vmatmul.mubr.bf16.vlgmr.msra.gmra.mrb[0].mxu1 %v122_v47 }
 0x1dd   :  { %v463_v52 = vpop.f32.mrb[0].mxu1 }
 0x1de   :  { %v464_v54 = vpop.f32.mrb[1].mxu1 }
 0x1df   :  { %v465_v55 = vadd.f32 %v464_v54, %v463_v52  ;;  %v466_v56 = vpop.f32.mrb[2].mxu1 }
 0x1e0   :  { %v467_v57 = vpop.f32.mrb[3].mxu1 }
 0x1e1   :  { %v293_v58 = vadd.f32 %v465_v55, %v161_v53 }
 0x1e3   :  { %v298_v59 = vmax.f32 %v293_v58, 0.0 }
 0x1e5   :  { %v299_v60 = vpack.c.bf16 %v298_v59, %v298_v59 }
 0x1e7   :  { %495 = vmatmul.mubr.bf16.vlgmr.msra.gmra.mrb[4].mxu0 %v299_v60 }
 0x2ba   :  { %v404_v0 = vpop.f32.mrb[4].mxu0 }
 0x2bb   :  { %v405_v1 = vadd.f32 %v404_v0, %v321_v63  ;;  %v496_v2 = vpop.f32.mrb[5].mxu0 }
 0x2bc   :  { %v407_v3 = vpop.f32.mrb[6].mxu0 }
 0x2bd   :  { %v410_v4 = vpack.c.bf16 %v405_v1, %v405_v1  ;;  %v497_v5 = vpop.f32.mrb[7].mxu0 }
 0x2bf   :  { %411 = vst [vmem:[%s641_s2] sm:$0xf] %v410_v4 }
 0x2c0   :  { %416 = vsyncpa [#allocation3], 1 }
 0x2c1   :  { %417 = vsyncpa [#allocation5], 1 }

</bundles_post_ra>
